<compile_context>
chip_gen: v7x
topology: tpu7x:2x2x1
jax: 0.10.0
libtpu: 0.0.40
codegen_flags: <defaults>
</compile_context>

<pallas_src>
import math

import numpy as np
import jax
import jax.numpy as jnp
from jax.experimental import pallas as pl
from jax.experimental.pallas import tpu as pltpu


def _round_up(x: int, m: int) -> int:
    return ((x + m - 1) // m) * m


def build_layer_dims(n_features: int, sequence_length: int, hidden_size: int):
    """Replicates AutoEncoderModel.__init__ layer-size computation exactly."""
    input_length = n_features * sequence_length
    dec_steps = 2 ** np.arange(
        max(np.ceil(np.log2(hidden_size)), 2), np.log2(input_length)
    )[1:]
    dec_setup = np.concatenate([[hidden_size], dec_steps.repeat(2), [input_length]])
    enc_setup = dec_setup[::-1]

    enc_pairs = [(int(a), int(b)) for a, b in enc_setup.reshape(-1, 2)]
    dec_pairs = [(int(a), int(b)) for a, b in dec_setup.reshape(-1, 2)]

    # nn.Sequential([Linear, Tanh] * n)[:-1] -> tanh after every Linear except the last
    # of each of encoder / decoder.
    pairs = enc_pairs + dec_pairs
    tanh_flags = (
        [True] * (len(enc_pairs) - 1) + [False]
        + [True] * (len(dec_pairs) - 1) + [False]
    )
    return pairs, tanh_flags


def init_params(pairs, key):
    """Deterministic init mimicking torch.nn.Linear default (U(-1/sqrt(in), 1/sqrt(in)))."""
    params = []
    for (din, dout) in pairs:
        key, kw, kb = jax.random.split(key, 3)
        bound = 1.0 / math.sqrt(din)
        w = jax.random.uniform(kw, (din, dout), jnp.float32, -bound, bound)
        b = jax.random.uniform(kb, (1, dout), jnp.float32, -bound, bound)
        params.append((w, b))
    return params


def pack_param_slab(params, tanh_flags, in_dim):
    """Pack all layer weights + biases into one (rows, lane_pad) f32 slab.

    Layer i's weight occupies rows [off_i : off_i + K_i), where K_i is the width of the
    activation entering layer i (in_dim for layer 0, lane_pad afterwards).  Output
    widths are zero-padded to lane_pad so every hidden activation is full-lane; since
    pad weight-columns and pad bias lanes are zero, pad lanes stay exactly 0 through
    bias-add and tanh, and the math is exact.
    Returns (slab, layer_meta, bias_row_offset, lane_pad) where
    layer_meta[i] = (row_offset, K_i, use_tanh) — all static Python values.
    """
    n_layers = len(params)
    max_dout = max(int(w.shape[1]) for w, _ in params)
    lane_pad = _round_up(max_dout, 128)

    blocks, layer_meta = [], []
    prev_width = in_dim
    row = 0
    for (w, b), t in zip(params, tanh_flags):
        din, dout = int(w.shape[0]), int(w.shape[1])
        rows = _round_up(prev_width, 8)          # keep every static slice 8-aligned
        blk = np.zeros((rows, lane_pad), np.float32)
        blk[:din, :dout] = np.asarray(w, np.float32)
        blocks.append(blk)
        layer_meta.append((row, prev_width, bool(t)))
        row += rows
        prev_width = lane_pad

    bias_row = row
    bias_blk = np.zeros((_round_up(n_layers, 8), lane_pad), np.float32)
    for i, (w, b) in enumerate(params):
        bias_blk[i, : int(w.shape[1])] = np.asarray(b, np.float32)[0]
    blocks.append(bias_blk)

    slab = jnp.asarray(np.concatenate(blocks, axis=0))
    return slab, layer_meta, bias_row, lane_pad


def make_autoencoder_kernel(layer_meta, bias_row, out_dim):
    """layer_meta: list of (slab_row_offset, K, use_tanh) per layer (static)."""

    def kernel(x_ref, slab_ref, out_ref):
        h = x_ref[...]                                   # (tile_b, in_dim) f32
        for i, (off, k, use_tanh) in enumerate(layer_meta):
            w = slab_ref[off:off + k, :]                 # static, 8-aligned slice
            b = slab_ref[bias_row + i:bias_row + i + 1, :]   # (1, lane_pad)
            h = jnp.dot(h, w, preferred_element_type=jnp.float32) + b
            if use_tanh:
                h = jnp.tanh(h)                          # EUP, full-lane f32
        out_ref[...] = h[:, :out_dim]                    # (tile_b, out_dim) store

    return kernel


def autoencoder_forward(x, params, tanh_flags, *, tile_cap=1024):
    """Forward pass: flatten -> encoder -> decoder -> reshape back (return_latent=False)."""
    B = int(x.shape[0])
    flat = x.reshape(B, -1).astype(jnp.float32)          # (B, in_dim), no lane padding
    in_dim = int(flat.shape[1])
    out_dim = int(params[-1][0].shape[1])                # == input_length == in_dim

    # ---- pack parameters into one VMEM-resident slab --------------------------
    slab, layer_meta, bias_row, lane_pad = pack_param_slab(params, tanh_flags, in_dim)
    slab_rows = int(slab.shape[0])

    # ---- batch tiling ----------------------------------------------------------
    # Big tiles to amortize the ~0.35us/step pipeline overhead; at least 2 tiles when
    # possible so the "parallel" axis shards across both v7x TensorCores; tile chosen
    # from cdiv(B, num_tiles) so last-tile padding stays small.
    num_tiles_target = max(2, pl.cdiv(B, tile_cap))
    tile_b = min(tile_cap, _round_up(pl.cdiv(B, num_tiles_target), 8))
    b_padded = _round_up(B, tile_b)
    num_tiles = b_padded // tile_b
    flat_p = flat if b_padded == B else jnp.pad(flat, ((0, b_padded - B), (0, 0)))

    # ---- cost estimate (consistent with actual padded compute / unpadded I/O) --
    flops = 2 * b_padded * sum(k * lane_pad for _, k, _ in layer_meta)
    transcendentals = b_padded * lane_pad * sum(1 for *_, t in layer_meta if t)
    bytes_accessed = 4 * (b_padded * in_dim + b_padded * out_dim
                          + slab_rows * lane_pad)

    dec = pl.pallas_call(
        make_autoencoder_kernel(layer_meta, bias_row, out_dim),
        out_shape=jax.ShapeDtypeStruct((b_padded, out_dim), jnp.float32),
        grid=(num_tiles,),
        in_specs=[
            # Activations: batch-tiled, full (unpadded) feature width (== array dim).
            pl.BlockSpec((tile_b, in_dim), lambda i: (i, 0)),
            # Parameter slab: constant block index -> DMA'd once, VMEM-resident.
            pl.BlockSpec((slab_rows, lane_pad), lambda i: (0, 0)),
        ],
        out_specs=pl.BlockSpec((tile_b, out_dim), lambda i: (i, 0)),
        compiler_params=pltpu.CompilerParams(
            dimension_semantics=("parallel",),   # megacore sharding on v7x; free elsewhere
        ),
        cost_estimate=pl.CostEstimate(
            flops=flops,
            transcendentals=transcendentals,
            bytes_accessed=bytes_accessed,
        ),
    )(flat_p, slab)

    reconstructed = dec[:B].reshape(x.shape)
    return reconstructed


if __name__ == "__main__":
    # Shapes consistent with the module:
    #   n_features=4, sequence_length=16 -> input_length=64, hidden_size=8
    #   encoder: 64->32 tanh, 32->16 tanh, 16->8
    #   decoder: 8->16 tanh, 16->32 tanh, 32->64
    n_features = 4
    sequence_length = 16
    hidden_size = 8
    batch = 2

    pairs, tanh_flags = build_layer_dims(n_features, sequence_length, hidden_size)

    key = jax.random.PRNGKey(0)
    key, pkey, xkey = jax.random.split(key, 3)
    params = init_params(pairs, pkey)

    x = jax.random.normal(xkey, (batch, sequence_length, n_features), jnp.float32)

    out = autoencoder_forward(x, params, tanh_flags)
    out = jax.block_until_ready(out)

    assert out.shape == x.shape, (out.shape, x.shape)
    assert out.dtype == jnp.float32

    # Reference check in plain JAX (original, unpadded layers, no fusion).
    h = x.reshape(batch, -1)
    for (w, b), t in zip(params, tanh_flags):
        h = jnp.dot(h, w, precision=jax.lax.Precision.HIGHEST) + b
        if t:
            h = jnp.tanh(h)
    ref = h.reshape(x.shape)
    np.testing.assert_allclose(np.asarray(out), np.asarray(ref), rtol=1e-5, atol=1e-5)

    print("KERNEL_OK")
</pallas_src>

<mosaic_0001>
module attributes {stable_mosaic.version = 11 : i64} {
  func.func @kernel(%arg0: i32, %arg1: memref<8x64xf32, #tpu.memory_space<vmem>>, %arg2: memref<712x128xf32, #tpu.memory_space<vmem>>, %arg3: memref<8x64xf32, #tpu.memory_space<vmem>>) attributes {dimension_semantics = [#tpu.dimension_semantics<parallel>], iteration_bounds = array<i64: 1>, scalar_prefetch = 0 : i64, scratch_operands = 0 : i64, tpu.core_type = #tpu.core_type<tc>, window_params = [{transform_indices = @transform_0, window_bounds = array<i64: 8, 64>}, {pipeline_mode = #tpu.pipeline_mode<synchronous>, transform_indices = @transform_1, window_bounds = array<i64: 712, 128>}, {transform_indices = @transform_2, window_bounds = array<i64: 8, 64>}]} {
    %c0 = arith.constant 0 : index
    %c0_0 = arith.constant 0 : index
    %0 = vector.load %arg1[%c0, %c0_0] : memref<8x64xf32, #tpu.memory_space<vmem>>, vector<8x64xf32>
    %c0_1 = arith.constant 0 : index
    %c0_2 = arith.constant 0 : index
    %1 = vector.load %arg2[%c0_1, %c0_2] : memref<712x128xf32, #tpu.memory_space<vmem>>, vector<64x128xf32>
    %c704 = arith.constant 704 : index
    %c0_3 = arith.constant 0 : index
    %2 = vector.load %arg2[%c704, %c0_3] : memref<712x128xf32, #tpu.memory_space<vmem>>, vector<1x128xf32>
    %cst = arith.constant dense<0.000000e+00> : vector<8x128xf32>
    %3 = tpu.matmul %0, %1, %cst {dimension_numbers = #tpu.dot_dimension_numbers<[1], [0], [0], [1], [0, 0, 1, 1], [], []>} : vector<8x64xf32>, vector<64x128xf32>, vector<8x128xf32> -> vector<8x128xf32>
    %4 = vector.broadcast %2 : vector<1x128xf32> to vector<8x128xf32>
    %5 = arith.addf %3, %4 : vector<8x128xf32>
    %6 = math.tanh %5 : vector<8x128xf32>
    %c64 = arith.constant 64 : index
    %c0_4 = arith.constant 0 : index
    %7 = vector.load %arg2[%c64, %c0_4] : memref<712x128xf32, #tpu.memory_space<vmem>>, vector<128x128xf32>
    %c705 = arith.constant 705 : index
    %c0_5 = arith.constant 0 : index
    %8 = vector.load %arg2[%c705, %c0_5] : memref<712x128xf32, #tpu.memory_space<vmem>>, vector<1x128xf32>
    %cst_6 = arith.constant dense<0.000000e+00> : vector<8x128xf32>
    %9 = tpu.matmul %6, %7, %cst_6 {dimension_numbers = #tpu.dot_dimension_numbers<[1], [0], [0], [1], [0, 0, 1, 1], [], []>} : vector<8x128xf32>, vector<128x128xf32>, vector<8x128xf32> -> vector<8x128xf32>
    %10 = vector.broadcast %8 : vector<1x128xf32> to vector<8x128xf32>
    %11 = arith.addf %9, %10 : vector<8x128xf32>
    %12 = math.tanh %11 : vector<8x128xf32>
    %c192 = arith.constant 192 : index
    %c0_7 = arith.constant 0 : index
    %13 = vector.load %arg2[%c192, %c0_7] : memref<712x128xf32, #tpu.memory_space<vmem>>, vector<128x128xf32>
    %c706 = arith.constant 706 : index
    %c0_8 = arith.constant 0 : index
    %14 = vector.load %arg2[%c706, %c0_8] : memref<712x128xf32, #tpu.memory_space<vmem>>, vector<1x128xf32>
    %cst_9 = arith.constant dense<0.000000e+00> : vector<8x128xf32>
    %15 = tpu.matmul %12, %13, %cst_9 {dimension_numbers = #tpu.dot_dimension_numbers<[1], [0], [0], [1], [0, 0, 1, 1], [], []>} : vector<8x128xf32>, vector<128x128xf32>, vector<8x128xf32> -> vector<8x128xf32>
    %16 = vector.broadcast %14 : vector<1x128xf32> to vector<8x128xf32>
    %17 = arith.addf %15, %16 : vector<8x128xf32>
    %c320 = arith.constant 320 : index
    %c0_10 = arith.constant 0 : index
    %18 = vector.load %arg2[%c320, %c0_10] : memref<712x128xf32, #tpu.memory_space<vmem>>, vector<128x128xf32>
    %c707 = arith.constant 707 : index
    %c0_11 = arith.constant 0 : index
    %19 = vector.load %arg2[%c707, %c0_11] : memref<712x128xf32, #tpu.memory_space<vmem>>, vector<1x128xf32>
    %cst_12 = arith.constant dense<0.000000e+00> : vector<8x128xf32>
    %20 = tpu.matmul %17, %18, %cst_12 {dimension_numbers = #tpu.dot_dimension_numbers<[1], [0], [0], [1], [0, 0, 1, 1], [], []>} : vector<8x128xf32>, vector<128x128xf32>, vector<8x128xf32> -> vector<8x128xf32>
    %21 = vector.broadcast %19 : vector<1x128xf32> to vector<8x128xf32>
    %22 = arith.addf %20, %21 : vector<8x128xf32>
    %23 = math.tanh %22 : vector<8x128xf32>
    %c448 = arith.constant 448 : index
    %c0_13 = arith.constant 0 : index
    %24 = vector.load %arg2[%c448, %c0_13] : memref<712x128xf32, #tpu.memory_space<vmem>>, vector<128x128xf32>
    %c708 = arith.constant 708 : index
    %c0_14 = arith.constant 0 : index
    %25 = vector.load %arg2[%c708, %c0_14] : memref<712x128xf32, #tpu.memory_space<vmem>>, vector<1x128xf32>
    %cst_15 = arith.constant dense<0.000000e+00> : vector<8x128xf32>
    %26 = tpu.matmul %23, %24, %cst_15 {dimension_numbers = #tpu.dot_dimension_numbers<[1], [0], [0], [1], [0, 0, 1, 1], [], []>} : vector<8x128xf32>, vector<128x128xf32>, vector<8x128xf32> -> vector<8x128xf32>
    %27 = vector.broadcast %25 : vector<1x128xf32> to vector<8x128xf32>
    %28 = arith.addf %26, %27 : vector<8x128xf32>
    %29 = math.tanh %28 : vector<8x128xf32>
    %c576 = arith.constant 576 : index
    %c0_16 = arith.constant 0 : index
    %30 = vector.load %arg2[%c576, %c0_16] : memref<712x128xf32, #tpu.memory_space<vmem>>, vector<128x128xf32>
    %c709 = arith.constant 709 : index
    %c0_17 = arith.constant 0 : index
    %31 = vector.load %arg2[%c709, %c0_17] : memref<712x128xf32, #tpu.memory_space<vmem>>, vector<1x128xf32>
    %cst_18 = arith.constant dense<0.000000e+00> : vector<8x128xf32>
    %32 = tpu.matmul %29, %30, %cst_18 {dimension_numbers = #tpu.dot_dimension_numbers<[1], [0], [0], [1], [0, 0, 1, 1], [], []>} : vector<8x128xf32>, vector<128x128xf32>, vector<8x128xf32> -> vector<8x128xf32>
    %33 = vector.broadcast %31 : vector<1x128xf32> to vector<8x128xf32>
    %34 = arith.addf %32, %33 : vector<8x128xf32>
    %35 = vector.extract_strided_slice %34 {offsets = [0, 0], sizes = [8, 64], strides = [1, 1]} : vector<8x128xf32> to vector<8x64xf32>
    %c0_19 = arith.constant 0 : index
    %c0_20 = arith.constant 0 : index
    %36 = vector.load %arg3[%c0_19, %c0_20] : memref<8x64xf32, #tpu.memory_space<vmem>>, vector<8x64xf32>
    tpu.vector_store %arg3[%c0_19, %c0_20], %35 {strides = array<i32>} : memref<8x64xf32, #tpu.memory_space<vmem>>, vector<8x64xf32>,
    return
  }
  func.func @transform_0(%arg0: i32) -> (i32, i32) {
    %c0_i32 = arith.constant 0 : i32
    %c0_i32_0 = arith.constant 0 : i32
    return %arg0, %c0_i32 : i32, i32
  }
  func.func @transform_1(%arg0: i32) -> (i32, i32) {
    %c0_i32 = arith.constant 0 : i32
    %c0_i32_0 = arith.constant 0 : i32
    %c0_i32_1 = arith.constant 0 : i32
    return %c0_i32, %c0_i32_0 : i32, i32
  }
  func.func @transform_2(%arg0: i32) -> (i32, i32) {
    %c0_i32 = arith.constant 0 : i32
    %c0_i32_0 = arith.constant 0 : i32
    return %arg0, %c0_i32 : i32, i32
  }
}

</mosaic_0001>

<bundles_post_ra>
// kernel: tpu_custom_call.1
= control target key start
LH: loop header
LB: loop body
LE: loop exit
PB: predicated region body
PF: predicated region fallthrough
CT: control target
= control target key end

     0   :  { %7 = vsyncpa [#allocation3], 0  ;;  %s1241_s0 = inlined_call_operand.hbm [shape: f32[8,64], index: 0, kind: input, shape index: {}]   ;;  %s1242_s1 = inlined_call_operand.hbm [shape: f32[712,128], index: 1, kind: input, shape index: {}]   ;;  %s1243_s2 = inlined_call_operand.hbm [shape: f32[8,64], index: 2, kind: output, shape index: {}]  }
   0x1   :  { %8 = vsyncpa [#allocation6], 0 }
   0x2   :  { %9 = vsyncpa [#allocation4], 0  ;;  %s1117_s9 = smov [#allocation2]   ;;  %s1118_s11 = smov [#allocation5]  }
   0x3   :  { %s16_s10 = sshll.u32 %s1117_s9, 4  ;;  %s25_s12 = sshll.u32 %s1118_s11, 4  ;;  %s17_s10 = int_to_ptr.vmem [resolvable:$true] %s16_s10  ;;  %s1140_s12 = int_to_ptr.vmem [resolvable:$true] %s25_s12 }
   0x4   :  { %s1045_s15 = scalar_lea.hbm %s1241_s0, 128 }
   0x5   :  { %p1046_p0 = scmp.ne.s32.totalorder %s1241_s0, %s1045_s15  ;;  %p1049_p1 = scmp.lt.u32.totalorder %s1045_s15, %s1241_s0 }
   0x7   :  { %p1051_p2 = pnand %p1049_p1, %p1046_p0 }
   0x9   :  { %1054 = shalt.err (!%p1051_p2)
}
   0xa   :  { %s1055_s20 = scalar_lea.vmem %s17_s10, 128  ;;  %p1060_p4 = scmp.lt.s32.totalorder %s17_s10, %s17_s10 }
   0xb   :  { %p1056_p3 = scmp.ne.s32.totalorder %s17_s10, %s1055_s20  ;;  %p1061_p5 = scmp.lt.s32.totalorder %s1055_s20, %s1055_s20 }
   0xd   :  { %p1062_p6 = por %p1061_p5, %p1060_p4 }
   0xf   :  { %p1063_p7 = pnand %p1062_p6, %p1056_p3 }
  0x11   :  { %1066 = shalt.err (!%p1063_p7)
}
  0x12   :  { %19 = dma.hbm_to_vmem [thread:$0]  %s1241_s0, 128, %s17_s10, [#allocation3]  }
  0x13   :  { %s1067_s25 = scalar_lea.hbm %s1242_s1, 11392 }
  0x14   :  { %p1068_p8 = scmp.ne.s32.totalorder %s1242_s1, %s1067_s25  ;;  %p1071_p9 = scmp.lt.u32.totalorder %s1067_s25, %s1242_s1 }
  0x16   :  { %p1073_p10 = pnand %p1071_p9, %p1068_p8 }
  0x18   :  { %1076 = shalt.err (!%p1073_p10)
}
  0x19   :  { %s1077_s30 = scalar_lea.vmem %s1140_s12, 11392  ;;  %p1082_p12 = scmp.lt.s32.totalorder %s1140_s12, %s1140_s12 }
  0x1a   :  { %p1078_p11 = scmp.ne.s32.totalorder %s1140_s12, %s1077_s30  ;;  %p1083_p13 = scmp.lt.s32.totalorder %s1077_s30, %s1077_s30 }
  0x1c   :  { %p1084_p0 = por %p1083_p13, %p1082_p12 }
  0x1e   :  { %p1085_p1 = pnand %p1084_p0, %p1078_p11 }
  0x20   :  { %1088 = shalt.err (!%p1085_p1)
}
  0x21   :  { %s1119_s0 = smov 128   ;;  %s1120_s3 = smov 8  }
  0x22   :  { %31 = dma.hbm_to_vmem [thread:$0]  %s1242_s1, 11392, %s1140_s12, [#allocation6], %s1119_s0, %s1119_s0, %s1120_s3  }
  0x23   :  { %1111 = dma.done.wait [#allocation3], 128  }
  0x24   :  { %1112 = vsyncadd [#allocation3], 4294967168 }
  0x25   :  { %1113 = dma.done.wait [#allocation6], 11392  }
  0x26   :  { %1114 = vsyncadd [#allocation6], 4294955904  ;;  %v1121_v0 = vmov 0.0|0.0   ;;  %vm1122_vm0 = vmmov 0   ;;  %v1123_v1 = vmov 0.0   ;;  %v39_v2 = vld [vmem:[#allocation5] sm:$0xff] }
  0x27   :  { %897 = vmatprep.subr.bf16.mxu0 %v1121_v0  ;;  %719 = vmatprep.mubr.msk.f32.mxu0 %vm1122_vm0, %v1123_v1  ;;  %v40_v3 = vld [vmem:[#allocation5 + $0x8] sm:$0xff]  ;;  %v41_v4 = vld [vmem:[#allocation5 + $0x10] sm:$0xff]  ;;  %v42_v6 = vld [vmem:[#allocation5 + $0x18] sm:$0xff]  ;;  %vm52_vm1 = vcmask 523264   ;;  %s1124_s1 = smov [#allocation7]  }
  0x28   :  { %909 = vmatprep.subr.bf16.mxu1 %v1121_v0  ;;  %754 = vmatprep.mubr.msk.f32.mxu1 %vm1122_vm0, %v1123_v1  ;;  %v898_v5 = vpack.c.bf16 %v40_v3, %v39_v2  ;;  %v901_v7 = vpack.c.bf16 %v42_v6, %v41_v4  ;;  %v127_v8 = vld [vmem:[#allocation5 + $0x40] sm:$0xff]  ;;  %v128_v9 = vld [vmem:[#allocation5 + $0x48] sm:$0xff]  ;;  %v129_v10 = vld [vmem:[#allocation5 + $0x50] sm:$0xff]  ;;  %s592_s6 = sshll.u32 %s1124_s1, 4  ;;  %s593_s6 = int_to_ptr.vmem [resolvable:$true] %s592_s6 }
  0x29   :  { %v43_v11 = vld [vmem:[#allocation5 + $0x20] sm:$0xff]  ;;  %v44_v12 = vld [vmem:[#allocation5 + $0x28] sm:$0xff]  ;;  %v910_v13 = vpack.c.bf16 %v128_v9, %v127_v8  ;;  %v130_v14 = vld [vmem:[#allocation5 + $0x58] sm:$0xff]  ;;  %s1089_s7 = scalar_lea.vmem %s593_s6, 128  ;;  %p1094_p3 = scmp.lt.s32.totalorder %s593_s6, %s593_s6 }
  0x2a   :  { %899 = vmatpush3.bf16.msra.mxu0 %v898_v5  ;;  %v913_v15 = vpack.c.bf16 %v130_v14, %v129_v10  ;;  %v904_v16 = vpack.c.bf16 %v44_v12, %v43_v11  ;;  %v131_v17 = vld [vmem:[#allocation5 + $0x60] sm:$0xff]  ;;  %v132_v18 = vld [vmem:[#allocation5 + $0x68] sm:$0xff]  ;;  %v45_v19 = vld [vmem:[#allocation5 + $0x30] sm:$0xff]  ;;  %p1090_p2 = scmp.ne.s32.totalorder %s593_s6, %s1089_s7  ;;  %p1095_p4 = scmp.lt.s32.totalorder %s1089_s7, %s1089_s7 }
  0x2b   :  { %900 = vmatprep.subr.bf16.mxu0 %v1121_v0  ;;  %911 = vmatpush3.bf16.msra.mxu1 %v910_v13  ;;  %v46_v20 = vld [vmem:[#allocation5 + $0x38] sm:$0xff]  ;;  %v916_v21 = vpack.c.bf16 %v132_v18, %v131_v17  ;;  %v133_v23 = vld [vmem:[#allocation5 + $0x70] sm:$0xff]  ;;  %v135_v27 = vld [vmem:[#allocation5 + $0x80] sm:$0xff] }
  0x2c   :  { %912 = vmatprep.subr.bf16.mxu1 %v1121_v0  ;;  %v907_v22 = vpack.c.bf16 %v46_v20, %v45_v19  ;;  %v134_v24 = vld [vmem:[#allocation5 + $0x78] sm:$0xff]  ;;  %v136_v28 = vld [vmem:[#allocation5 + $0x88] sm:$0xff]  ;;  %v137_v30 = vld [vmem:[#allocation5 + $0x90] sm:$0xff]  ;;  %p1096_p5 = por %p1095_p4, %p1094_p3 }
  0x2d   :  { %v919_v25 = vpack.c.bf16 %v134_v24, %v133_v23  ;;  %v38_v26 = vld [vmem:[#allocation2] sm:$0xff]  ;;  %v922_v29 = vpack.c.bf16 %v136_v28, %v135_v27  ;;  %v139_v33 = vld [vmem:[#allocation5 + $0xa0] sm:$0xff]  ;;  %v140_v34 = vld [vmem:[#allocation5 + $0xa8] sm:$0xff] }
  0x2e   :  { %902 = vmatpush3.bf16.msra.mxu0 %v901_v7  ;;  %v138_v31 = vld [vmem:[#allocation5 + $0x98] sm:$0xff]  ;;  %v928_v35 = vpack.c.bf16 %v140_v34, %v139_v33  ;;  %v141_v36 = vld [vmem:[#allocation5 + $0xb0] sm:$0xff]  ;;  %v219_v39 = vld [vmem:[#allocation5 + $0xc0] sm:$0xff]  ;;  %p1097_p6 = pnand %p1096_p5, %p1090_p2 }
  0x2f   :  { %903 = vmatprep.subr.bf16.mxu0 %v1121_v0  ;;  %914 = vmatpush3.bf16.msra.mxu1 %v913_v15  ;;  %v925_v32 = vpack.c.bf16 %v138_v31, %v137_v30  ;;  %v142_v37 = vld [vmem:[#allocation5 + $0xb8] sm:$0xff]  ;;  %v220_v40 = vld [vmem:[#allocation5 + $0xc8] sm:$0xff]  ;;  %v221_v41 = vld [vmem:[#allocation5 + $0xd0] sm:$0xff] }
  0x30   :  { %915 = vmatprep.subr.bf16.mxu1 %v1121_v0  ;;  %v931_v38 = vpack.c.bf16 %v142_v37, %v141_v36  ;;  %v934_v42 = vpack.c.bf16 %v220_v40, %v219_v39  ;;  %v222_v43 = vld [vmem:[#allocation5 + $0xd8] sm:$0xff]  ;;  %v223_v45 = vld [vmem:[#allocation5 + $0xe0] sm:$0xff]  ;;  %v224_v46 = vld [vmem:[#allocation5 + $0xe8] sm:$0xff] }
  0x31   :  { %v937_v44 = vpack.c.bf16 %v222_v43, %v221_v41  ;;  %v940_v47 = vpack.c.bf16 %v224_v46, %v223_v45  ;;  %v225_v48 = vld [vmem:[#allocation5 + $0xf0] sm:$0xff]  ;;  %v226_v49 = vld [vmem:[#allocation5 + $0xf8] sm:$0xff]  ;;  %v227_v51 = vld [vmem:[#allocation5 + $0x100] sm:$0xff] }
  0x32   :  { %905 = vmatpush3.bf16.msra.mxu0 %v904_v16  ;;  %v943_v50 = vpack.c.bf16 %v226_v49, %v225_v48  ;;  %v228_v52 = vld [vmem:[#allocation5 + $0x108] sm:$0xff]  ;;  %v602_v54 = vld [vmem:[#allocation5 + $0x2c0] ss:$0 sm:$0xff]  ;;  %v229_v59 = vld [vmem:[#allocation5 + $0x110] sm:$0xff] }
  0x33   :  { %906 = vmatprep.subr.bf16.mxu0 %v1121_v0  ;;  %917 = vmatpush3.bf16.msra.mxu1 %v916_v21  ;;  %v946_v53 = vpack.c.bf16 %v228_v52, %v227_v51  ;;  %v230_v60 = vld [vmem:[#allocation5 + $0x118] sm:$0xff]  ;;  %v231_v62 = vld [vmem:[#allocation5 + $0x120] sm:$0xff]  ;;  %v232_v63 = vld [vmem:[#allocation5 + $0x128] sm:$0xff] }
  0x34   :  { %918 = vmatprep.subr.bf16.mxu1 %v1121_v0  ;;  %v949_v61 = vpack.c.bf16 %v230_v60, %v229_v59  ;;  %v952_v2 = vpack.c.bf16 %v232_v63, %v231_v62  ;;  %v233_v3 = vld [vmem:[#allocation5 + $0x130] sm:$0xff]  ;;  %v234_v4 = vld [vmem:[#allocation5 + $0x138] sm:$0xff]  ;;  %v310_v6 = vld [vmem:[#allocation5 + $0x140] sm:$0xff] }
  0x35   :  { %v955_v5 = vpack.c.bf16 %v234_v4, %v233_v3  ;;  %v311_v7 = vld [vmem:[#allocation5 + $0x148] sm:$0xff]  ;;  %v312_v8 = vld [vmem:[#allocation5 + $0x150] sm:$0xff]  ;;  %v313_v10 = vld [vmem:[#allocation5 + $0x158] sm:$0xff] }
  0x36   :  { %908 = vmatpush3.bf16.msra.mxu0 %v907_v22  ;;  %v958_v9 = vpack.c.bf16 %v311_v7, %v310_v6  ;;  %v961_v11 = vpack.c.bf16 %v313_v10, %v312_v8  ;;  %v314_v12 = vld [vmem:[#allocation5 + $0x160] sm:$0xff]  ;;  %v315_v13 = vld [vmem:[#allocation5 + $0x168] sm:$0xff]  ;;  %v316_v15 = vld [vmem:[#allocation5 + $0x170] sm:$0xff] }
  0x37   :  { %933 = vmatprep.subr.bf16.mxu0 %v1121_v0  ;;  %920 = vmatpush3.bf16.msra.mxu1 %v919_v25  ;;  %v964_v14 = vpack.c.bf16 %v315_v13, %v314_v12  ;;  %v317_v16 = vld [vmem:[#allocation5 + $0x178] sm:$0xff]  ;;  %v318_v18 = vld [vmem:[#allocation5 + $0x180] sm:$0xff]  ;;  %v319_v19 = vld [vmem:[#allocation5 + $0x188] sm:$0xff] }
  0x38   :  { %921 = vmatprep.subr.bf16.mxu1 %v1121_v0  ;;  %v967_v17 = vpack.c.bf16 %v317_v16, %v316_v15  ;;  %v970_v20 = vpack.c.bf16 %v319_v19, %v318_v18  ;;  %v320_v21 = vld [vmem:[#allocation5 + $0x190] sm:$0xff]  ;;  %v321_v22 = vld [vmem:[#allocation5 + $0x198] sm:$0xff]  ;;  %v322_v24 = vld [vmem:[#allocation5 + $0x1a0] sm:$0xff] }
  0x39   :  { %720 = vmatmul.mubr.msk.f32.vlgmr.msra.gmra.mrb[0].mxu0 %vm52_vm1, %v38_v26  ;;  %v973_v23 = vpack.c.bf16 %v321_v22, %v320_v21  ;;  %v323_v25 = vld [vmem:[#allocation5 + $0x1a8] sm:$0xff]  ;;  %v604_v27 = vld [vmem:[#allocation5 + $0x2c1] ss:$0 sm:$0xff]  ;;  %v325_v33 = vld [vmem:[#allocation5 + $0x1b8] sm:$0xff] }
  0x3a   :  { %789 = vmatprep.mubr.msk.f32.mxu0 %vm1122_vm0, %v1123_v1  ;;  %935 = vmatpush3.bf16.msra.mxu0 %v934_v42  ;;  %v976_v26 = vpack.c.bf16 %v323_v25, %v322_v24  ;;  %v403_v36 = vld [vmem:[#allocation5 + $0x1c8] sm:$0xff]  ;;  %v404_v37 = vld [vmem:[#allocation5 + $0x1d0] sm:$0xff]  ;;  %v405_v39 = vld [vmem:[#allocation5 + $0x1d8] sm:$0xff] }
  0x3b   :  { %923 = vmatpush3.bf16.msra.mxu1 %v922_v29  ;;  %936 = vmatprep.subr.bf16.mxu0 %v1121_v0  ;;  %v985_v40 = vpack.c.bf16 %v405_v39, %v404_v37  ;;  %v406_v41 = vld [vmem:[#allocation5 + $0x1e0] sm:$0xff]  ;;  %v407_v42 = vld [vmem:[#allocation5 + $0x1e8] sm:$0xff]  ;;  %v409_v45 = vld [vmem:[#allocation5 + $0x1f8] sm:$0xff] }
  0x3c   :  { %924 = vmatprep.subr.bf16.mxu1 %v1121_v0  ;;  %v988_v43 = vpack.c.bf16 %v407_v42, %v406_v41  ;;  %v411_v48 = vld [vmem:[#allocation5 + $0x208] sm:$0xff]  ;;  %v416_v60 = vld [vmem:[#allocation5 + $0x230] sm:$0xff]  ;;  %v494_v63 = vld [vmem:[#allocation5 + $0x240] sm:$0xff] }
  0x3d   :  { %v496_v3 = vld [vmem:[#allocation5 + $0x250] sm:$0xff]  ;;  %v497_v4 = vld [vmem:[#allocation5 + $0x258] sm:$0xff]  ;;  %v498_v6 = vld [vmem:[#allocation5 + $0x260] sm:$0xff] }
  0x3e   :  { %938 = vmatpush3.bf16.msra.mxu0 %v937_v44  ;;  %v408_v44 = vld [vmem:[#allocation5 + $0x1f0] sm:$0xff]  ;;  %v499_v7 = vld [vmem:[#allocation5 + $0x268] sm:$0xff]  ;;  %v501_v10 = vld [vmem:[#allocation5 + $0x278] sm:$0xff] }
  0x3f   :  { %926 = vmatpush3.bf16.msra.mxu1 %v925_v32  ;;  %939 = vmatprep.subr.bf16.mxu0 %v1121_v0  ;;  %v324_v32 = vld [vmem:[#allocation5 + $0x1b0] sm:$0xff]  ;;  %v991_v46 = vpack.c.bf16 %v409_v45, %v408_v44  ;;  %v1012_v8 = vpack.c.bf16 %v499_v7, %v498_v6  ;;  %v502_v12 = vld [vmem:[#allocation5 + $0x280] sm:$0xff]  ;;  %v503_v13 = vld [vmem:[#allocation5 + $0x288] sm:$0xff] }
  0x40   :  { %927 = vmatprep.subr.bf16.mxu1 %v1121_v0  ;;  %v979_v34 = vpack.c.bf16 %v325_v33, %v324_v32  ;;  %v606_v15 = vld [vmem:[#allocation5 + $0x2c3] ss:$0 sm:$0xff]  ;;  %v505_v21 = vld [vmem:[#allocation5 + $0x298] sm:$0xff]  ;;  %v507_v24 = vld [vmem:[#allocation5 + $0x2a8] sm:$0xff] }
  0x42   :  { %941 = vmatpush3.bf16.msra.mxu0 %v940_v47  ;;  %v410_v47 = vld [vmem:[#allocation5 + $0x200] sm:$0xff] }
  0x43   :  { %929 = vmatpush3.bf16.msra.mxu1 %v928_v35  ;;  %942 = vmatprep.subr.bf16.mxu0 %v1121_v0  ;;  %v402_v35 = vld [vmem:[#allocation5 + $0x1c0] sm:$0xff]  ;;  %v994_v49 = vpack.c.bf16 %v411_v48, %v410_v47 }
  0x44   :  { %930 = vmatprep.subr.bf16.mxu1 %v1121_v0 }
  0x46   :  { %944 = vmatpush3.bf16.msra.mxu0 %v943_v50  ;;  %v605_v50 = vld [vmem:[#allocation5 + $0x2c2] ss:$0 sm:$0xff] }
  0x47   :  { %932 = vmatpush3.bf16.msra.mxu1 %v931_v38  ;;  %945 = vmatprep.subr.bf16.mxu0 %v1121_v0  ;;  %v982_v38 = vpack.c.bf16 %v403_v36, %v402_v35 }
  0x48   :  { %957 = vmatprep.subr.bf16.mxu1 %v1121_v0 }
  0x4a   :  { %947 = vmatpush3.bf16.msra.mxu0 %v946_v53 }
  0x4b   :  { %948 = vmatprep.subr.bf16.mxu0 %v1121_v0 }
  0x4e   :  { %950 = vmatpush3.bf16.msra.mxu0 %v949_v61  ;;  %v417_v61 = vld [vmem:[#allocation5 + $0x238] sm:$0xff] }
  0x4f   :  { %951 = vmatprep.subr.bf16.mxu0 %v1121_v0  ;;  %v1003_v62 = vpack.c.bf16 %v417_v61, %v416_v60 }
  0x52   :  { %953 = vmatpush3.bf16.msra.mxu0 %v952_v2  ;;  %v495_v2 = vld [vmem:[#allocation5 + $0x248] sm:$0xff] }
  0x53   :  { %954 = vmatprep.subr.bf16.mxu0 %v1121_v0 }
  0x56   :  { %956 = vmatpush3.bf16.msra.mxu0 %v955_v5  ;;  %v1009_v5 = vpack.c.bf16 %v497_v4, %v496_v3 }
  0x57   :  { %981 = vmatprep.subr.bf16.mxu0 %v1121_v0 }
 0x10c   :  { %v122_v55 = vpop.f32.mrb[0].mxu0 }
 0x10d   :  { %v123_v56 = vadd.f32 %v602_v54, %v122_v55  ;;  %v721_v57 = vpop.f32.mrb[1].mxu0  ;;  %v412_v54 = vld [vmem:[#allocation5 + $0x210] sm:$0xff]  ;;  %v413_v55 = vld [vmem:[#allocation5 + $0x218] sm:$0xff] }
 0x10e   :  { %v414_v57 = vld [vmem:[#allocation5 + $0x220] sm:$0xff] }
 0x10f   :  { %1037 = vtanh.f32 %v123_v56  ;;  %v997_v56 = vpack.c.bf16 %v413_v55, %v412_v54 }
 0x119   :  { %v1038_v58 = vpop.eup %1037 }
 0x11a   :  { %755 = vmatmul.mubr.f32.vlgmr.msra.gmra.mrb[0].mxu1 %v1038_v58  ;;  %v415_v58 = vld [vmem:[#allocation5 + $0x228] sm:$0xff] }
 0x11b   :  { %824 = vmatprep.mubr.msk.f32.mxu1 %vm1122_vm0, %v1123_v1  ;;  %959 = vmatpush3.bf16.msra.mxu1 %v958_v9  ;;  %v1000_v59 = vpack.c.bf16 %v415_v58, %v414_v57  ;;  %v500_v9 = vld [vmem:[#allocation5 + $0x270] sm:$0xff] }
 0x11c   :  { %960 = vmatprep.subr.bf16.mxu1 %v1121_v0 }
 0x11f   :  { %962 = vmatpush3.bf16.msra.mxu1 %v961_v11  ;;  %v1015_v11 = vpack.c.bf16 %v501_v10, %v500_v9 }
 0x120   :  { %963 = vmatprep.subr.bf16.mxu1 %v1121_v0 }
 0x123   :  { %965 = vmatpush3.bf16.msra.mxu1 %v964_v14  ;;  %v1018_v14 = vpack.c.bf16 %v503_v13, %v502_v12 }
 0x124   :  { %966 = vmatprep.subr.bf16.mxu1 %v1121_v0 }
 0x127   :  { %968 = vmatpush3.bf16.msra.mxu1 %v967_v17 }
 0x128   :  { %969 = vmatprep.subr.bf16.mxu1 %v1121_v0 }
 0x12b   :  { %971 = vmatpush3.bf16.msra.mxu1 %v970_v20  ;;  %v504_v20 = vld [vmem:[#allocation5 + $0x290] sm:$0xff] }
 0x12c   :  { %972 = vmatprep.subr.bf16.mxu1 %v1121_v0  ;;  %v1021_v22 = vpack.c.bf16 %v505_v21, %v504_v20 }
 0x12f   :  { %974 = vmatpush3.bf16.msra.mxu1 %v973_v23  ;;  %v506_v23 = vld [vmem:[#allocation5 + $0x2a0] sm:$0xff] }
 0x130   :  { %975 = vmatprep.subr.bf16.mxu1 %v1121_v0  ;;  %v1024_v25 = vpack.c.bf16 %v507_v24, %v506_v23 }
 0x133   :  { %977 = vmatpush3.bf16.msra.mxu1 %v976_v26  ;;  %v508_v26 = vld [vmem:[#allocation5 + $0x2b0] sm:$0xff] }
 0x134   :  { %978 = vmatprep.subr.bf16.mxu1 %v1121_v0 }
 0x137   :  { %980 = vmatpush3.bf16.msra.mxu1 %v979_v34  ;;  %v608_v34 = vld [vmem:[#allocation5 + $0x2c5] ss:$0 sm:$0xff] }
 0x138   :  { %1005 = vmatprep.subr.bf16.mxu1 %v1121_v0 }
 0x1ed   :  { %v214_v28 = vpop.f32.mrb[0].mxu1 }
 0x1ee   :  { %v215_v29 = vadd.f32 %v604_v27, %v214_v28  ;;  %v756_v30 = vpop.f32.mrb[1].mxu1  ;;  %v509_v27 = vld [vmem:[#allocation5 + $0x2b8] sm:$0xff] }
 0x1ef   :  { %v1027_v28 = vpack.c.bf16 %v509_v27, %v508_v26 }
 0x1f0   :  { %1039 = vtanh.f32 %v215_v29  ;;  %v607_v29 = vld [vmem:[#allocation5 + $0x2c4] ss:$0 sm:$0xff] }
 0x1fa   :  { %v1040_v31 = vpop.eup %1039 }
 0x1fb   :  { %790 = vmatmul.mubr.f32.vlgmr.msra.gmra.mrb[2].mxu0 %v1040_v31 }
 0x1fc   :  { %859 = vmatprep.mubr.msk.f32.mxu0 %vm1122_vm0, %v1123_v1  ;;  %983 = vmatpush3.bf16.msra.mxu0 %v982_v38 }
 0x1fd   :  { %984 = vmatprep.subr.bf16.mxu0 %v1121_v0 }
 0x200   :  { %986 = vmatpush3.bf16.msra.mxu0 %v985_v40 }
 0x201   :  { %987 = vmatprep.subr.bf16.mxu0 %v1121_v0 }
 0x204   :  { %989 = vmatpush3.bf16.msra.mxu0 %v988_v43 }
 0x205   :  { %990 = vmatprep.subr.bf16.mxu0 %v1121_v0 }
 0x208   :  { %992 = vmatpush3.bf16.msra.mxu0 %v991_v46 }
 0x209   :  { %993 = vmatprep.subr.bf16.mxu0 %v1121_v0 }
 0x20c   :  { %995 = vmatpush3.bf16.msra.mxu0 %v994_v49 }
 0x20d   :  { %996 = vmatprep.subr.bf16.mxu0 %v1121_v0 }
 0x210   :  { %998 = vmatpush3.bf16.msra.mxu0 %v997_v56 }
 0x211   :  { %999 = vmatprep.subr.bf16.mxu0 %v1121_v0 }
 0x214   :  { %1001 = vmatpush3.bf16.msra.mxu0 %v1000_v59 }
 0x215   :  { %1002 = vmatprep.subr.bf16.mxu0 %v1121_v0 }
 0x218   :  { %1004 = vmatpush3.bf16.msra.mxu0 %v1003_v62 }
 0x2ce   :  { %v306_v51 = vpop.f32.mrb[2].mxu0 }
 0x2cf   :  { %v307_v52 = vadd.f32 %v605_v50, %v306_v51  ;;  %v791_v53 = vpop.f32.mrb[3].mxu0 }
 0x2d1   :  { %825 = vmatmul.mubr.f32.vlgmr.msra.gmra.mrb[2].mxu1 %v307_v52 }
 0x2d2   :  { %894 = vmatprep.mubr.msk.f32.mxu1 %vm1122_vm0, %v1123_v1  ;;  %v1006_v1 = vpack.c.bf16 %v495_v2, %v494_v63 }
 0x2d4   :  { %1007 = vmatpush3.bf16.msra.mxu1 %v1006_v1 }
 0x2d5   :  { %1008 = vmatprep.subr.bf16.mxu1 %v1121_v0 }
 0x2d8   :  { %1010 = vmatpush3.bf16.msra.mxu1 %v1009_v5 }
 0x2d9   :  { %1011 = vmatprep.subr.bf16.mxu1 %v1121_v0 }
 0x2dc   :  { %1013 = vmatpush3.bf16.msra.mxu1 %v1012_v8 }
 0x2dd   :  { %1014 = vmatprep.subr.bf16.mxu1 %v1121_v0 }
 0x2e0   :  { %1016 = vmatpush3.bf16.msra.mxu1 %v1015_v11 }
 0x2e1   :  { %1017 = vmatprep.subr.bf16.mxu1 %v1121_v0 }
 0x2e4   :  { %1019 = vmatpush3.bf16.msra.mxu1 %v1018_v14 }
 0x2e5   :  { %1020 = vmatprep.subr.bf16.mxu1 %v1121_v0 }
 0x2e8   :  { %1022 = vmatpush3.bf16.msra.mxu1 %v1021_v22 }
 0x2e9   :  { %1023 = vmatprep.subr.bf16.mxu1 %v1121_v0 }
 0x2ec   :  { %1025 = vmatpush3.bf16.msra.mxu1 %v1024_v25 }
 0x2ed   :  { %1026 = vmatprep.subr.bf16.mxu1 %v1121_v0 }
 0x2f0   :  { %1028 = vmatpush3.bf16.msra.mxu1 %v1027_v28 }
 0x3a4   :  { %v397_v16 = vpop.f32.mrb[2].mxu1 }
 0x3a5   :  { %v398_v17 = vadd.f32 %v606_v15, %v397_v16  ;;  %v826_v18 = vpop.f32.mrb[3].mxu1 }
 0x3a7   :  { %1041 = vtanh.f32 %v398_v17 }
 0x3b1   :  { %v1042_v19 = vpop.eup %1041 }
 0x3b2   :  { %860 = vmatmul.mubr.f32.vlgmr.msra.gmra.mrb[4].mxu0 %v1042_v19 }
 0x485   :  { %v489_v30 = vpop.f32.mrb[4].mxu0 }
 0x486   :  { %v490_v31 = vadd.f32 %v607_v29, %v489_v30  ;;  %v861_v32 = vpop.f32.mrb[5].mxu0 }
 0x488   :  { %1043 = vtanh.f32 %v490_v31 }
 0x492   :  { %v1044_v33 = vpop.eup %1043 }
 0x493   :  { %895 = vmatmul.mubr.f32.vlgmr.msra.gmra.mrb[4].mxu1 %v1044_v33 }
 0x566   :  { %v581_v35 = vpop.f32.mrb[4].mxu1 }
 0x567   :  { %v582_v36 = vadd.f32 %v608_v34, %v581_v35  ;;  %v896_v37 = vpop.f32.mrb[5].mxu1 }
 0x569   :  { %585 = vst.msk [vmem:[#allocation7] sm:$0xff] %vm52_vm1, %v582_v36 }
 0x56a   :  { %1100 = shalt.err (!%p1097_p6)
}
 0x56b   :  { %s1101_s10 = scalar_lea.hbm %s1243_s2, 128 }
 0x56c   :  { %p1102_p7 = scmp.ne.s32.totalorder %s1243_s2, %s1101_s10  ;;  %p1105_p8 = scmp.lt.u32.totalorder %s1101_s10, %s1243_s2 }
 0x56e   :  { %p1107_p9 = pnand %p1105_p8, %p1102_p7 }
 0x570   :  { %1110 = shalt.err (!%p1107_p9)
}
 0x571   :  { %595 = dma.vmem_to_hbm [thread:$0]  %s593_s6, 128, %s1243_s2, [#allocation4]  }
 0x572   :  { %1115 = dma.done.wait [#allocation4], 128  }
 0x573   :  { %1116 = vsyncadd [#allocation4], 4294967168 }
 0x574   :  { %599 = vsyncpa [#allocation3], 1 }
 0x575   :  { %600 = vsyncpa [#allocation6], 1 }
 0x576   :  { %601 = vsyncpa [#allocation4], 1 }

</bundles_post_ra>
